<compile_context>
chip_gen: v7x
topology: tpu7x:2x2x1
jax: 0.10.0
libtpu: 0.0.40
codegen_flags: <defaults>
</compile_context>

<pallas_src>
import functools

import jax
import jax.numpy as jnp
from jax import lax
from jax.experimental import pallas as pl
from jax.experimental.pallas import tpu as pltpu


# ---------------------------------------------------------------------------
# Small helpers.
# ---------------------------------------------------------------------------
def _round_up(x, m):
    return (x + m - 1) // m * m


def _pad2d(a, rows, cols):
    r, c = a.shape
    if r == rows and c == cols:
        return a
    return jnp.pad(a, ((0, rows - r), (0, cols - c)))


def _choose_tile(dim, cap):
    """Pad `dim` to an MXU-friendly alignment, then pick the largest tile that
    is a multiple of the alignment, divides the padded extent and is <= cap.

    256-alignment keeps the 256x256 MXU of v6e/v7x full; when the dimension is
    too small for that to pay off we fall back to 128 (enough for v5e's 128x128
    MXU and avoids doubling padding on small layers)."""
    p128 = _round_up(dim, 128)
    align = 256 if (p128 >= 256 and p128 % 256 == 0) else 128
    padded = _round_up(dim, align)
    tile = align
    t = align
    while t <= min(cap, padded):
        if padded % t == 0:
            tile = t
        t += align
    return tile, padded


# ---------------------------------------------------------------------------
# Pallas kernel: tiled matmul with f32 accumulator; folded-BN, fused shortcut
# (identity residual OR 1x1-conv projection) and activation applied only at
# the last K step.
# ---------------------------------------------------------------------------
def _matmul_bn_act_kernel(*refs, apply_act, mode):
    if mode == "proj":
        x_ref, w_ref, sb_ref, xs_ref, ws_ref, sbs_ref, o_ref, acc_ref = refs
    elif mode == "residual":
        x_ref, w_ref, sb_ref, res_ref, o_ref, acc_ref = refs
    else:  # "plain"
        x_ref, w_ref, sb_ref, o_ref, acc_ref = refs

    k = pl.program_id(2)

    @pl.when(k == 0)
    def _init():
        acc_ref[...] = jnp.zeros_like(acc_ref)

    acc_ref[...] += jnp.dot(x_ref[...], w_ref[...],
                            preferred_element_type=jnp.float32)

    @pl.when(k == pl.num_programs(2) - 1)
    def _finalize():
        sb = sb_ref[...]                                   # (2, tn): scale, bias
        out = acc_ref[...] * sb[0:1, :] + sb[1:2, :]       # folded eval-mode BN
        if mode == "proj":
            # Fused 1x1-conv + BN shortcut: one small (K = Cin) matmul, its
            # operands are K-invariant so they were DMA'd once per output tile.
            sbs = sbs_ref[...]
            sc = jnp.dot(xs_ref[...], ws_ref[...],
                         preferred_element_type=jnp.float32)
            out = out + sc * sbs[0:1, :] + sbs[1:2, :]
        elif mode == "residual":
            out = out + res_ref[...].astype(jnp.float32)   # identity shortcut
        if apply_act:
            # TODO(synk): GEDReLU definition not provided -> plain ReLU.
            out = jnp.maximum(out, 0.0)
        o_ref[...] = out.astype(o_ref.dtype)


def _fused_conv_matmul(x2d, w2d, sb, *, residual=None, proj=None,
                       apply_act, out_dtype=jnp.float32,
                       tm_max=512, tk_max=2048, tn_max=512):
    """out = act( (x2d @ w2d) * scale + bias + shortcut ), tiled on the MXU.

    shortcut is either `residual` (identity add) or the fused 1x1 projection
    `proj = (xs, ws, sbs)` computed in the epilogue.  x2d/w2d are consumed as
    bf16; accumulation is f32."""
    M, K = x2d.shape
    K2, N = w2d.shape
    assert K == K2
    assert residual is None or proj is None

    tm, Mp = _choose_tile(M, tm_max)
    tk, Kp = _choose_tile(K, tk_max)
    tn, Np = _choose_tile(N, tn_max)

    # v7x has two TensorCores: give the parallel part of the grid >= 2 tiles
    # when the problem allows it (tm stays a multiple of 128 and divides Mp).
    if (Mp // tm) * (Np // tn) < 2 and tm >= 256 and tm % 256 == 0:
        tm //= 2

    out_itemsize = jnp.dtype(out_dtype).itemsize

    xp = _pad2d(x2d.astype(jnp.bfloat16), Mp, Kp)
    wp = _pad2d(w2d.astype(jnp.bfloat16), Kp, Np)
    sbp = _pad2d(sb.astype(jnp.float32), 2, Np)            # packed scale+bias

    in_specs = [
        pl.BlockSpec((tm, tk), lambda i, j, k: (i, k)),
        pl.BlockSpec((tk, tn), lambda i, j, k: (k, j)),
        pl.BlockSpec((2, tn), lambda i, j, k: (0, j)),
    ]
    args = [xp, wp, sbp]

    mode = "plain"
    extra_bytes = 0
    extra_flops = 0
    extra_vmem = 0

    if residual is not None:
        mode = "residual"
        rp = _pad2d(residual.astype(jnp.bfloat16), Mp, Np)
        # K-invariant block index -> DMA'd once per output tile, not per K step.
        in_specs.append(pl.BlockSpec((tm, tn), lambda i, j, k: (i, j)))
        args.append(rp)
        extra_bytes = Mp * Np * 2
        extra_vmem = 2 * tm * tn * 2
    elif proj is not None:
        mode = "proj"
        xs, ws, sbs = proj
        Cs = _round_up(xs.shape[1], 128)   # zero-pad contraction dim (exact)
        xsp = _pad2d(xs.astype(jnp.bfloat16), Mp, Cs)
        wsp = _pad2d(ws.astype(jnp.bfloat16), Cs, Np)
        sbsp = _pad2d(sbs.astype(jnp.float32), 2, Np)
        in_specs += [
            pl.BlockSpec((tm, Cs), lambda i, j, k: (i, 0)),
            pl.BlockSpec((Cs, tn), lambda i, j, k: (0, j)),
            pl.BlockSpec((2, tn), lambda i, j, k: (0, j)),
        ]
        args += [xsp, wsp, sbsp]
        extra_bytes = Mp * Cs * 2 + Cs * Np * 2 + 2 * Np * 4
        extra_flops = 2 * Mp * Cs * Np
        extra_vmem = 2 * (tm * Cs + Cs * tn) * 2 + 2 * 2 * tn * 4

    bytes_accessed = (Mp * Kp * 2 + Kp * Np * 2 + 2 * Np * 4
                      + Mp * Np * out_itemsize + extra_bytes)
    flops = 2 * Mp * Kp * Np + extra_flops

    # VMEM budget: double-buffered bf16 operands + double-buffered output +
    # f32 accumulator + fused-shortcut operands, with generous headroom but a
    # ceiling that fits v7x's 64 MiB per-TensorCore VMEM.
    est = (2 * (tm * tk + tk * tn) * 2 + 2 * 2 * tn * 4
           + 2 * tm * tn * out_itemsize + tm * tn * 4 + extra_vmem)
    vmem_limit = int(min(40 * 1024 * 1024, max(2 * est, 16 * 1024 * 1024)))

    kernel = functools.partial(_matmul_bn_act_kernel,
                               apply_act=apply_act, mode=mode)

    out = pl.pallas_call(
        kernel,
        out_shape=jax.ShapeDtypeStruct((Mp, Np), out_dtype),
        grid_spec=pltpu.PrefetchScalarGridSpec(
            num_scalar_prefetch=0,
            grid=(Mp // tm, Np // tn, Kp // tk),
            in_specs=in_specs,
            out_specs=pl.BlockSpec((tm, tn), lambda i, j, k: (i, j)),
            scratch_shapes=[pltpu.VMEM((tm, tn), jnp.float32)],
        ),
        compiler_params=pltpu.CompilerParams(
            dimension_semantics=("parallel", "parallel", "arbitrary"),
            vmem_limit_bytes=vmem_limit,
        ),
        cost_estimate=pl.CostEstimate(
            flops=flops, transcendentals=0, bytes_accessed=bytes_accessed),
    )(*args)

    return out[:M, :N]


# ---------------------------------------------------------------------------
# Glue: bf16 im2col patch extraction, BN folding, one-time weight preparation.
# ---------------------------------------------------------------------------
def _im2col_3x3(x_nhwc, stride):
    """3x3 / padding-1 patch extraction (already in bf16)."""
    n, h, w, c = x_nhwc.shape
    ho = (h + 2 - 3) // stride + 1
    wo = (w + 2 - 3) // stride + 1
    xp = jnp.pad(x_nhwc, ((0, 0), (1, 1), (1, 1), (0, 0)))
    cols = []
    for dy in range(3):
        for dx in range(3):
            patch = lax.slice(
                xp,
                (0, dy, dx, 0),
                (n, dy + (ho - 1) * stride + 1, dx + (wo - 1) * stride + 1, c),
                (1, stride, stride, 1),
            )
            cols.append(patch)
    patches = jnp.concatenate(cols, axis=-1)            # [n, ho, wo, 9*c]
    return patches.reshape(n * ho * wo, 9 * c), (n, ho, wo)


def _fold_bn(gamma, beta, mean, var, eps=1e-5):
    scale = gamma / jnp.sqrt(var + eps)
    bias = beta - mean * scale
    return scale, bias


def prepare_params(params, stride, eps=1e-5):
    """One-time (eval-mode) preprocessing hoisted out of the forward path:
    fold BN into per-channel scale/bias (packed (2, C) blocks), reshape conv
    weights to matmul layout and cast them to bf16."""
    planes, in_planes = params["conv1_w"].shape[:2]
    s1, b1 = _fold_bn(params["bn1_gamma"], params["bn1_beta"],
                      params["bn1_mean"], params["bn1_var"], eps)
    s2, b2 = _fold_bn(params["bn2_gamma"], params["bn2_beta"],
                      params["bn2_mean"], params["bn2_var"], eps)
    prepared = {
        "w1": params["conv1_w"].transpose(2, 3, 1, 0)
                               .reshape(9 * in_planes, planes)
                               .astype(jnp.bfloat16),
        "sb1": jnp.stack([s1, b1]).astype(jnp.float32),
        "w2": params["conv2_w"].transpose(2, 3, 1, 0)
                               .reshape(9 * planes, planes)
                               .astype(jnp.bfloat16),
        "sb2": jnp.stack([s2, b2]).astype(jnp.float32),
    }
    if stride != 1 or in_planes != planes:
        ss, bs = _fold_bn(params["bns_gamma"], params["bns_beta"],
                          params["bns_mean"], params["bns_var"], eps)
        prepared["ws"] = params["sc_w"].transpose(2, 3, 1, 0) \
                                       .reshape(in_planes, planes) \
                                       .astype(jnp.bfloat16)
        prepared["sbs"] = jnp.stack([ss, bs]).astype(jnp.float32)
    return prepared


# ---------------------------------------------------------------------------
# GEDBasicBlock forward (eval-mode BatchNorm with running statistics).
# ---------------------------------------------------------------------------
def ged_basic_block_forward(x_nchw, prepared, stride):
    # NCHW -> NHWC, bf16 activations (MXU operands; accumulation stays f32).
    x = jnp.transpose(x_nchw, (0, 2, 3, 1)).astype(jnp.bfloat16)
    _, _, _, cin = x.shape
    planes = prepared["w1"].shape[1]

    # --- conv1 (3x3, stride) + bn1 + act1, fused ---------------------------
    x2d, (n, ho, wo) = _im2col_3x3(x, stride)
    out1 = _fused_conv_matmul(x2d, prepared["w1"], prepared["sb1"],
                              apply_act=True, out_dtype=jnp.bfloat16)
    out1_nhwc = out1.reshape(n, ho, wo, planes)

    # --- conv2 (3x3, stride 1) + bn2 + shortcut + act2, one kernel ---------
    x2d2, _ = _im2col_3x3(out1_nhwc, 1)
    if "ws" in prepared:
        # Projection shortcut (1x1 conv + BN) fused into the conv2 epilogue.
        xs = x[:, ::stride, ::stride, :].reshape(n * ho * wo, cin)
        out2 = _fused_conv_matmul(x2d2, prepared["w2"], prepared["sb2"],
                                  proj=(xs, prepared["ws"], prepared["sbs"]),
                                  apply_act=True, out_dtype=jnp.float32)
    else:
        # Identity shortcut fed as a bf16 residual operand (add done in f32).
        res = x.reshape(n * ho * wo, planes)
        out2 = _fused_conv_matmul(x2d2, prepared["w2"], prepared["sb2"],
                                  residual=res, apply_act=True,
                                  out_dtype=jnp.float32)

    out_nhwc = out2.reshape(n, ho, wo, planes)
    return jnp.transpose(out_nhwc, (0, 3, 1, 2))                  # NCHW


# ---------------------------------------------------------------------------
# Pure-JAX f32 reference (for correctness check).
# ---------------------------------------------------------------------------
def _ref_conv(x, w, stride, pad):
    return lax.conv_general_dilated(
        x, w, (stride, stride), [(pad, pad), (pad, pad)],
        dimension_numbers=("NCHW", "OIHW", "NCHW"))


def _ref_bn(x, gamma, beta, mean, var, eps=1e-5):
    sh = (1, -1, 1, 1)
    return (x - mean.reshape(sh)) / jnp.sqrt(var.reshape(sh) + eps) \
        * gamma.reshape(sh) + beta.reshape(sh)


def ged_basic_block_reference(x, params, stride):
    planes = params["conv1_w"].shape[0]
    cin = x.shape[1]
    out = _ref_conv(x, params["conv1_w"], stride, 1)
    out = _ref_bn(out, params["bn1_gamma"], params["bn1_beta"],
                  params["bn1_mean"], params["bn1_var"])
    out = jnp.maximum(out, 0.0)
    out = _ref_conv(out, params["conv2_w"], 1, 1)
    out = _ref_bn(out, params["bn2_gamma"], params["bn2_beta"],
                  params["bn2_mean"], params["bn2_var"])
    if stride != 1 or cin != planes:
        sc = _ref_conv(x, params["sc_w"], stride, 0)
        sc = _ref_bn(sc, params["bns_gamma"], params["bns_beta"],
                     params["bns_mean"], params["bns_var"])
    else:
        sc = x
    return jnp.maximum(out + sc, 0.0)


# ---------------------------------------------------------------------------
def make_params(key, in_planes, planes):
    ks = jax.random.split(key, 12)
    p = {
        "conv1_w": 0.1 * jax.random.normal(ks[0], (planes, in_planes, 3, 3), jnp.float32),
        "conv2_w": 0.1 * jax.random.normal(ks[1], (planes, planes, 3, 3), jnp.float32),
        "sc_w":    0.1 * jax.random.normal(ks[2], (planes, in_planes, 1, 1), jnp.float32),
        "bn1_gamma": 1.0 + 0.1 * jax.random.normal(ks[3], (planes,), jnp.float32),
        "bn1_beta":  0.1 * jax.random.normal(ks[4], (planes,), jnp.float32),
        "bn1_mean":  0.1 * jax.random.normal(ks[5], (planes,), jnp.float32),
        "bn1_var":   jax.random.uniform(ks[6], (planes,), jnp.float32, 0.5, 1.5),
        "bn2_gamma": 1.0 + 0.1 * jax.random.normal(ks[7], (planes,), jnp.float32),
        "bn2_beta":  0.1 * jax.random.normal(ks[8], (planes,), jnp.float32),
        "bn2_mean":  0.1 * jax.random.normal(ks[9], (planes,), jnp.float32),
        "bn2_var":   jax.random.uniform(ks[10], (planes,), jnp.float32, 0.5, 1.5),
    }
    ks2 = jax.random.split(ks[11], 4)
    p["bns_gamma"] = 1.0 + 0.1 * jax.random.normal(ks2[0], (planes,), jnp.float32)
    p["bns_beta"] = 0.1 * jax.random.normal(ks2[1], (planes,), jnp.float32)
    p["bns_mean"] = 0.1 * jax.random.normal(ks2[2], (planes,), jnp.float32)
    p["bns_var"] = jax.random.uniform(ks2[3], (planes,), jnp.float32, 0.5, 1.5)
    return p


if __name__ == "__main__":
    forward = jax.jit(ged_basic_block_forward, static_argnums=(2,))
    reference = jax.jit(ged_basic_block_reference, static_argnums=(2,))

    key = jax.random.PRNGKey(0)

    # Case 1: downsampling block (stride=2, channel expansion -> the 1x1-conv
    # shortcut is fused into the conv2 kernel epilogue).
    kx, kp, key = jax.random.split(key, 3)
    batch, in_planes, planes, hw, stride = 2, 4, 8, 16, 2
    x = jax.random.normal(kx, (batch, in_planes, hw, hw), jnp.float32)
    params = make_params(kp, in_planes, planes)
    prepared = prepare_params(params, stride)      # one-time eval-mode prep

    out = jax.block_until_ready(forward(x, prepared, stride))
    ref = jax.block_until_ready(reference(x, params, stride))
    assert out.shape == ref.shape == (batch, planes, hw // stride, hw // stride)
    # bf16 MXU operands / bf16 intermediate with f32 accumulation -> loosened
    # tolerance vs the f32 reference.
    assert jnp.allclose(out, ref, atol=5e-2, rtol=5e-2), \
        f"mismatch vs reference (max abs err {jnp.max(jnp.abs(out - ref))})"

    # Case 2: identity-shortcut block (stride=1, same channels).
    kx2, kp2 = jax.random.split(key)
    x2 = jax.random.normal(kx2, (batch, planes, hw, hw), jnp.float32)
    params2 = make_params(kp2, planes, planes)
    prepared2 = prepare_params(params2, 1)

    out2 = jax.block_until_ready(forward(x2, prepared2, 1))
    ref2 = jax.block_until_ready(reference(x2, params2, 1))
    assert out2.shape == ref2.shape == (batch, planes, hw, hw)
    assert jnp.allclose(out2, ref2, atol=5e-2, rtol=5e-2), \
        f"mismatch vs reference (max abs err {jnp.max(jnp.abs(out2 - ref2))})"

    print("KERNEL_OK")
</pallas_src>

<mosaic_0001>
module attributes {stable_mosaic.version = 11 : i64} {
  func.func @_matmul_bn_act_kernel(%arg0: i32, %arg1: i32, %arg2: i32, %arg3: memref<128x128xbf16, #tpu.memory_space<vmem>>, %arg4: memref<128x128xbf16, #tpu.memory_space<vmem>>, %arg5: memref<2x128xf32, #tpu.memory_space<vmem>>, %arg6: memref<128x128xbf16, #tpu.memory_space<vmem>>, %arg7: memref<128x128xf32, #tpu.memory_space<vmem>>) attributes {dimension_semantics = [#tpu.dimension_semantics<parallel>, #tpu.dimension_semantics<parallel>, #tpu.dimension_semantics<arbitrary>], iteration_bounds = array<i64: 1, 1, 1>, scalar_prefetch = 0 : i64, scratch_operands = 1 : i64, tpu.core_type = #tpu.core_type<tc>, window_params = [{transform_indices = @transform_0, window_bounds = array<i64: 128, 128>}, {transform_indices = @transform_1, window_bounds = array<i64: 128, 128>}, {transform_indices = @transform_2, window_bounds = array<i64: 2, 128>}, {transform_indices = @transform_3, window_bounds = array<i64: 128, 128>}]} {
    %c0_i32 = arith.constant 0 : i32
    %0 = arith.cmpi eq, %arg2, %c0_i32 : i32
    %1 = arith.extui %0 : i1 to i32
    %c0_i32_0 = arith.constant 0 : i32
    %2 = arith.cmpi ne, %1, %c0_i32_0 : i32
    scf.if %2 {
      %cst_10 = arith.constant 0.000000e+00 : f32
      %12 = vector.broadcast %cst_10 : f32 to vector<128x128xf32>
      %c0_11 = arith.constant 0 : index
      %c0_12 = arith.constant 0 : index
      %13 = vector.load %arg7[%c0_11, %c0_12] : memref<128x128xf32, #tpu.memory_space<vmem>>, vector<128x128xf32>
      tpu.vector_store %arg7[%c0_11, %c0_12], %12 {strides = array<i32>} : memref<128x128xf32, #tpu.memory_space<vmem>>, vector<128x128xf32>,
    } else {
    }
    %c0 = arith.constant 0 : index
    %c0_1 = arith.constant 0 : index
    %3 = vector.load %arg7[%c0, %c0_1] : memref<128x128xf32, #tpu.memory_space<vmem>>, vector<128x128xf32>
    %c0_2 = arith.constant 0 : index
    %c0_3 = arith.constant 0 : index
    %4 = vector.load %arg3[%c0_2, %c0_3] : memref<128x128xbf16, #tpu.memory_space<vmem>>, vector<128x128xbf16>
    %c0_4 = arith.constant 0 : index
    %c0_5 = arith.constant 0 : index
    %5 = vector.load %arg4[%c0_4, %c0_5] : memref<128x128xbf16, #tpu.memory_space<vmem>>, vector<128x128xbf16>
    %cst = arith.constant dense<0.000000e+00> : vector<128x128xf32>
    %6 = tpu.matmul %4, %5, %cst {dimension_numbers = #tpu.dot_dimension_numbers<[1], [0], [0], [1], [0, 0, 1, 1], [], []>} : vector<128x128xbf16>, vector<128x128xbf16>, vector<128x128xf32> -> vector<128x128xf32>
    %7 = arith.addf %3, %6 : vector<128x128xf32>
    %c0_6 = arith.constant 0 : index
    %c0_7 = arith.constant 0 : index
    %8 = vector.load %arg7[%c0_6, %c0_7] : memref<128x128xf32, #tpu.memory_space<vmem>>, vector<128x128xf32>
    tpu.vector_store %arg7[%c0_6, %c0_7], %7 {strides = array<i32>} : memref<128x128xf32, #tpu.memory_space<vmem>>, vector<128x128xf32>,
    %c0_i32_8 = arith.constant 0 : i32
    %9 = arith.cmpi eq, %arg2, %c0_i32_8 : i32
    %10 = arith.extui %9 : i1 to i32
    %c0_i32_9 = arith.constant 0 : i32
    %11 = arith.cmpi ne, %10, %c0_i32_9 : i32
    scf.if %11 {
      %c0_10 = arith.constant 0 : index
      %c0_11 = arith.constant 0 : index
      %12 = vector.load %arg5[%c0_10, %c0_11] : memref<2x128xf32, #tpu.memory_space<vmem>>, vector<2x128xf32>
      %c0_12 = arith.constant 0 : index
      %c0_13 = arith.constant 0 : index
      %13 = vector.load %arg7[%c0_12, %c0_13] : memref<128x128xf32, #tpu.memory_space<vmem>>, vector<128x128xf32>
      %14 = vector.extract_strided_slice %12 {offsets = [0, 0], sizes = [1, 128], strides = [1, 1]} : vector<2x128xf32> to vector<1x128xf32>
      %15 = vector.broadcast %14 : vector<1x128xf32> to vector<128x128xf32>
      %16 = arith.mulf %13, %15 : vector<128x128xf32>
      %17 = vector.extract_strided_slice %12 {offsets = [1, 0], sizes = [1, 128], strides = [1, 1]} : vector<2x128xf32> to vector<1x128xf32>
      %18 = vector.broadcast %17 : vector<1x128xf32> to vector<128x128xf32>
      %19 = arith.addf %16, %18 : vector<128x128xf32>
      %cst_14 = arith.constant 0.000000e+00 : f32
      %20 = vector.broadcast %cst_14 : f32 to vector<128x128xf32>
      %21 = arith.maximumf %19, %20 : vector<128x128xf32>
      %22 = arith.truncf %21 : vector<128x128xf32> to vector<128x128xbf16>
      %c0_15 = arith.constant 0 : index
      %c0_16 = arith.constant 0 : index
      %23 = vector.load %arg6[%c0_15, %c0_16] : memref<128x128xbf16, #tpu.memory_space<vmem>>, vector<128x128xbf16>
      tpu.vector_store %arg6[%c0_15, %c0_16], %22 {strides = array<i32>} : memref<128x128xbf16, #tpu.memory_space<vmem>>, vector<128x128xbf16>,
    } else {
    }
    return
  }
  func.func @transform_0(%arg0: i32, %arg1: i32, %arg2: i32) -> (i32, i32) {
    %c0_i32 = arith.constant 0 : i32
    return %arg0, %arg2 : i32, i32
  }
  func.func @transform_1(%arg0: i32, %arg1: i32, %arg2: i32) -> (i32, i32) {
    %c0_i32 = arith.constant 0 : i32
    return %arg2, %arg1 : i32, i32
  }
  func.func @transform_2(%arg0: i32, %arg1: i32, %arg2: i32) -> (i32, i32) {
    %c0_i32 = arith.constant 0 : i32
    %c0_i32_0 = arith.constant 0 : i32
    return %c0_i32, %arg1 : i32, i32
  }
  func.func @transform_3(%arg0: i32, %arg1: i32, %arg2: i32) -> (i32, i32) {
    %c0_i32 = arith.constant 0 : i32
    return %arg0, %arg1 : i32, i32
  }
}

module attributes {stable_mosaic.version = 11 : i64} {
  func.func @_matmul_bn_act_kernel(%arg0: i32, %arg1: i32, %arg2: i32, %arg3: memref<128x128xbf16, #tpu.memory_space<vmem>>, %arg4: memref<128x128xbf16, #tpu.memory_space<vmem>>, %arg5: memref<2x128xf32, #tpu.memory_space<vmem>>, %arg6: memref<128x128xbf16, #tpu.memory_space<vmem>>, %arg7: memref<128x128xbf16, #tpu.memory_space<vmem>>, %arg8: memref<2x128xf32, #tpu.memory_space<vmem>>, %arg9: memref<128x128xf32, #tpu.memory_space<vmem>>, %arg10: memref<128x128xf32, #tpu.memory_space<vmem>>) attributes {dimension_semantics = [#tpu.dimension_semantics<parallel>, #tpu.dimension_semantics<parallel>, #tpu.dimension_semantics<arbitrary>], iteration_bounds = array<i64: 1, 1, 1>, scalar_prefetch = 0 : i64, scratch_operands = 1 : i64, tpu.core_type = #tpu.core_type<tc>, window_params = [{transform_indices = @transform_0, window_bounds = array<i64: 128, 128>}, {transform_indices = @transform_1, window_bounds = array<i64: 128, 128>}, {transform_indices = @transform_2, window_bounds = array<i64: 2, 128>}, {transform_indices = @transform_3, window_bounds = array<i64: 128, 128>}, {transform_indices = @transform_4, window_bounds = array<i64: 128, 128>}, {transform_indices = @transform_5, window_bounds = array<i64: 2, 128>}, {transform_indices = @transform_6, window_bounds = array<i64: 128, 128>}]} {
    %c0_i32 = arith.constant 0 : i32
    %0 = arith.cmpi eq, %arg2, %c0_i32 : i32
    %1 = arith.extui %0 : i1 to i32
    %c0_i32_0 = arith.constant 0 : i32
    %2 = arith.cmpi ne, %1, %c0_i32_0 : i32
    scf.if %2 {
      %cst_10 = arith.constant 0.000000e+00 : f32
      %12 = vector.broadcast %cst_10 : f32 to vector<128x128xf32>
      %c0_11 = arith.constant 0 : index
      %c0_12 = arith.constant 0 : index
      %13 = vector.load %arg10[%c0_11, %c0_12] : memref<128x128xf32, #tpu.memory_space<vmem>>, vector<128x128xf32>
      tpu.vector_store %arg10[%c0_11, %c0_12], %12 {strides = array<i32>} : memref<128x128xf32, #tpu.memory_space<vmem>>, vector<128x128xf32>,
    } else {
    }
    %c0 = arith.constant 0 : index
    %c0_1 = arith.constant 0 : index
    %3 = vector.load %arg10[%c0, %c0_1] : memref<128x128xf32, #tpu.memory_space<vmem>>, vector<128x128xf32>
    %c0_2 = arith.constant 0 : index
    %c0_3 = arith.constant 0 : index
    %4 = vector.load %arg3[%c0_2, %c0_3] : memref<128x128xbf16, #tpu.memory_space<vmem>>, vector<128x128xbf16>
    %c0_4 = arith.constant 0 : index
    %c0_5 = arith.constant 0 : index
    %5 = vector.load %arg4[%c0_4, %c0_5] : memref<128x128xbf16, #tpu.memory_space<vmem>>, vector<128x128xbf16>
    %cst = arith.constant dense<0.000000e+00> : vector<128x128xf32>
    %6 = tpu.matmul %4, %5, %cst {dimension_numbers = #tpu.dot_dimension_numbers<[1], [0], [0], [1], [0, 0, 1, 1], [], []>} : vector<128x128xbf16>, vector<128x128xbf16>, vector<128x128xf32> -> vector<128x128xf32>
    %7 = arith.addf %3, %6 : vector<128x128xf32>
    %c0_6 = arith.constant 0 : index
    %c0_7 = arith.constant 0 : index
    %8 = vector.load %arg10[%c0_6, %c0_7] : memref<128x128xf32, #tpu.memory_space<vmem>>, vector<128x128xf32>
    tpu.vector_store %arg10[%c0_6, %c0_7], %7 {strides = array<i32>} : memref<128x128xf32, #tpu.memory_space<vmem>>, vector<128x128xf32>,
    %c0_i32_8 = arith.constant 0 : i32
    %9 = arith.cmpi eq, %arg2, %c0_i32_8 : i32
    %10 = arith.extui %9 : i1 to i32
    %c0_i32_9 = arith.constant 0 : i32
    %11 = arith.cmpi ne, %10, %c0_i32_9 : i32
    scf.if %11 {
      %c0_10 = arith.constant 0 : index
      %c0_11 = arith.constant 0 : index
      %12 = vector.load %arg5[%c0_10, %c0_11] : memref<2x128xf32, #tpu.memory_space<vmem>>, vector<2x128xf32>
      %c0_12 = arith.constant 0 : index
      %c0_13 = arith.constant 0 : index
      %13 = vector.load %arg10[%c0_12, %c0_13] : memref<128x128xf32, #tpu.memory_space<vmem>>, vector<128x128xf32>
      %14 = vector.extract_strided_slice %12 {offsets = [0, 0], sizes = [1, 128], strides = [1, 1]} : vector<2x128xf32> to vector<1x128xf32>
      %15 = vector.broadcast %14 : vector<1x128xf32> to vector<128x128xf32>
      %16 = arith.mulf %13, %15 : vector<128x128xf32>
      %17 = vector.extract_strided_slice %12 {offsets = [1, 0], sizes = [1, 128], strides = [1, 1]} : vector<2x128xf32> to vector<1x128xf32>
      %18 = vector.broadcast %17 : vector<1x128xf32> to vector<128x128xf32>
      %19 = arith.addf %16, %18 : vector<128x128xf32>
      %c0_14 = arith.constant 0 : index
      %c0_15 = arith.constant 0 : index
      %20 = vector.load %arg8[%c0_14, %c0_15] : memref<2x128xf32, #tpu.memory_space<vmem>>, vector<2x128xf32>
      %c0_16 = arith.constant 0 : index
      %c0_17 = arith.constant 0 : index
      %21 = vector.load %arg6[%c0_16, %c0_17] : memref<128x128xbf16, #tpu.memory_space<vmem>>, vector<128x128xbf16>
      %c0_18 = arith.constant 0 : index
      %c0_19 = arith.constant 0 : index
      %22 = vector.load %arg7[%c0_18, %c0_19] : memref<128x128xbf16, #tpu.memory_space<vmem>>, vector<128x128xbf16>
      %cst_20 = arith.constant dense<0.000000e+00> : vector<128x128xf32>
      %23 = tpu.matmul %21, %22, %cst_20 {dimension_numbers = #tpu.dot_dimension_numbers<[1], [0], [0], [1], [0, 0, 1, 1], [], []>} : vector<128x128xbf16>, vector<128x128xbf16>, vector<128x128xf32> -> vector<128x128xf32>
      %24 = vector.extract_strided_slice %20 {offsets = [0, 0], sizes = [1, 128], strides = [1, 1]} : vector<2x128xf32> to vector<1x128xf32>
      %25 = vector.broadcast %24 : vector<1x128xf32> to vector<128x128xf32>
      %26 = arith.mulf %23, %25 : vector<128x128xf32>
      %27 = arith.addf %19, %26 : vector<128x128xf32>
      %28 = vector.extract_strided_slice %20 {offsets = [1, 0], sizes = [1, 128], strides = [1, 1]} : vector<2x128xf32> to vector<1x128xf32>
      %29 = vector.broadcast %28 : vector<1x128xf32> to vector<128x128xf32>
      %30 = arith.addf %27, %29 : vector<128x128xf32>
      %cst_21 = arith.constant 0.000000e+00 : f32
      %31 = vector.broadcast %cst_21 : f32 to vector<128x128xf32>
      %32 = arith.maximumf %30, %31 : vector<128x128xf32>
      %c0_22 = arith.constant 0 : index
      %c0_23 = arith.constant 0 : index
      %33 = vector.load %arg9[%c0_22, %c0_23] : memref<128x128xf32, #tpu.memory_space<vmem>>, vector<128x128xf32>
      tpu.vector_store %arg9[%c0_22, %c0_23], %32 {strides = array<i32>} : memref<128x128xf32, #tpu.memory_space<vmem>>, vector<128x128xf32>,
    } else {
    }
    return
  }
  func.func @transform_0(%arg0: i32, %arg1: i32, %arg2: i32) -> (i32, i32) {
    %c0_i32 = arith.constant 0 : i32
    return %arg0, %arg2 : i32, i32
  }
  func.func @transform_1(%arg0: i32, %arg1: i32, %arg2: i32) -> (i32, i32) {
    %c0_i32 = arith.constant 0 : i32
    return %arg2, %arg1 : i32, i32
  }
  func.func @transform_2(%arg0: i32, %arg1: i32, %arg2: i32) -> (i32, i32) {
    %c0_i32 = arith.constant 0 : i32
    %c0_i32_0 = arith.constant 0 : i32
    return %c0_i32, %arg1 : i32, i32
  }
  func.func @transform_3(%arg0: i32, %arg1: i32, %arg2: i32) -> (i32, i32) {
    %c0_i32 = arith.constant 0 : i32
    %c0_i32_0 = arith.constant 0 : i32
    return %arg0, %c0_i32 : i32, i32
  }
  func.func @transform_4(%arg0: i32, %arg1: i32, %arg2: i32) -> (i32, i32) {
    %c0_i32 = arith.constant 0 : i32
    %c0_i32_0 = arith.constant 0 : i32
    return %c0_i32, %arg1 : i32, i32
  }
  func.func @transform_5(%arg0: i32, %arg1: i32, %arg2: i32) -> (i32, i32) {
    %c0_i32 = arith.constant 0 : i32
    %c0_i32_0 = arith.constant 0 : i32
    return %c0_i32, %arg1 : i32, i32
  }
  func.func @transform_6(%arg0: i32, %arg1: i32, %arg2: i32) -> (i32, i32) {
    %c0_i32 = arith.constant 0 : i32
    return %arg0, %arg1 : i32, i32
  }
}

</mosaic_0001>

<bundles_post_ra>
// kernel: ged_basic_block_forward.2
= control target key start
LH: loop header
LB: loop body
LE: loop exit
PB: predicated region body
PF: predicated region fallthrough
CT: control target
= control target key end

     0   :  { %v328_v16 = vlaneseq  ;;  %s756_s1 = inlined_call_operand.vmem [shape: bf16[128,128], index: 1, kind: input, shape index: {}]   ;;  %s757_s0 = inlined_call_operand.vmem [shape: bf16[128,128], index: 0, kind: input, shape index: {}]   ;;  %s758_s2 = inlined_call_operand.vmem [shape: f32[2,128], index: 2, kind: input, shape index: {}]   ;;  %s759_s3 = inlined_call_operand.vmem [shape: bf16[128,128], index: 3, kind: output, shape index: {}]  }
   0x1   :  { %v627_v0 = vld [vmem:[%s756_s1] sm:$0xff]   ;;  %v628_v1 = vld [vmem:[%s756_s1 + $0x8] sm:$0xff]   ;;  %v629_v2 = vld [vmem:[%s756_s1 + $0x10] sm:$0xff]  }
   0x2   :  { %579 = vmatprep.subr.bf16.mxu0 %v627_v0  ;;  %611 = vmatprep.subr.bf16.mxu1 %v627_v0  ;;  %v630_v3 = vld [vmem:[%s756_s1 + $0x18] sm:$0xff]   ;;  %v635_v4 = vld [vmem:[%s757_s0] sm:$0xff]   ;;  %v632_v7 = vld [vmem:[%s756_s1 + $0x28] sm:$0xff]   ;;  %v329_v17 = vshrl.u32 %v328_v16, 7 }
   0x3   :  { %580 = vmatpush3.bf16.msra.mxu0 %v627_v0  ;;  %619 = vmatpush3.bf16.msra.mxu1 %v627_v0  ;;  %v636_v5 = vld [vmem:[%s757_s0 + $0x20] sm:$0xff]   ;;  %v633_v8 = vld [vmem:[%s756_s1 + $0x30] sm:$0xff]   ;;  %v634_v9 = vld [vmem:[%s756_s1 + $0x38] sm:$0xff]  }
   0x4   :  { %581 = vmatprep.subr.bf16.mxu0 %v628_v1  ;;  %612 = vmatprep.subr.bf16.mxu1 %v628_v1  ;;  %v631_v6 = vld [vmem:[%s756_s1 + $0x20] sm:$0xff]   ;;  %v637_v10 = vld [vmem:[%s757_s0 + $0x8] sm:$0xff]   ;;  %v639_v12 = vld [vmem:[%s757_s0 + $0x10] sm:$0xff]   ;;  %v330_v18 = vsub.s32 0, %v329_v17  ;;  %v350_v20 = vsub.s32 1, %v329_v17 }
   0x5   :  { %595 = vmatprep.mubr.bf16.mxu0 %v635_v4  ;;  %603 = vmatprep.mubr.bf16.mxu1 %v636_v5  ;;  %v638_v11 = vld [vmem:[%s757_s0 + $0x28] sm:$0xff]   ;;  %v640_v13 = vld [vmem:[%s757_s0 + $0x30] sm:$0xff]   ;;  %v641_v14 = vld [vmem:[%s757_s0 + $0x18] sm:$0xff]  }
   0x6   :  { %v642_v15 = vld [vmem:[%s757_s0 + $0x38] sm:$0xff]   ;;  %v311_v19 = vld [vmem:[%s758_s2] sm:$0x3] }
   0x7   :  { %582 = vmatpush3.bf16.msra.mxu0 %v628_v1  ;;  %620 = vmatpush3.bf16.msra.mxu1 %v628_v1  ;;  %v331_v21 = vrot.slane %v311_v19, %v330_v18  ;;  %v714_v22 = vrot.slane %v311_v19, %v350_v20 }
   0x8   :  { %583 = vmatprep.subr.bf16.mxu0 %v629_v2  ;;  %613 = vmatprep.subr.bf16.mxu1 %v629_v2 }
   0xb   :  { %584 = vmatpush3.bf16.msra.mxu0 %v629_v2  ;;  %621 = vmatpush3.bf16.msra.mxu1 %v629_v2 }
   0xc   :  { %585 = vmatprep.subr.bf16.mxu0 %v630_v3  ;;  %614 = vmatprep.subr.bf16.mxu1 %v630_v3 }
   0xf   :  { %586 = vmatpush3.bf16.msra.mxu0 %v630_v3  ;;  %622 = vmatpush3.bf16.msra.mxu1 %v630_v3 }
  0x10   :  { %587 = vmatprep.subr.bf16.mxu0 %v631_v6  ;;  %615 = vmatprep.subr.bf16.mxu1 %v631_v6 }
  0x13   :  { %588 = vmatpush3.bf16.msra.mxu0 %v631_v6  ;;  %623 = vmatpush3.bf16.msra.mxu1 %v631_v6 }
  0x14   :  { %589 = vmatprep.subr.bf16.mxu0 %v632_v7  ;;  %616 = vmatprep.subr.bf16.mxu1 %v632_v7 }
  0x17   :  { %590 = vmatpush3.bf16.msra.mxu0 %v632_v7  ;;  %624 = vmatpush3.bf16.msra.mxu1 %v632_v7 }
  0x18   :  { %591 = vmatprep.subr.bf16.mxu0 %v633_v8  ;;  %617 = vmatprep.subr.bf16.mxu1 %v633_v8 }
  0x1b   :  { %592 = vmatpush3.bf16.msra.mxu0 %v633_v8  ;;  %625 = vmatpush3.bf16.msra.mxu1 %v633_v8 }
  0x1c   :  { %593 = vmatprep.subr.bf16.mxu0 %v634_v9  ;;  %618 = vmatprep.subr.bf16.mxu1 %v634_v9 }
  0x1f   :  { %594 = vmatpush3.bf16.msra.mxu0 %v634_v9  ;;  %626 = vmatpush3.bf16.msra.mxu1 %v634_v9 }
  0x22   :  { %596 = vmatmul.mubr.bf16.vlgmr.msra.gmra.mrb[0].mxu0 %v637_v10  ;;  %604 = vmatmul.mubr.bf16.vlgmr.msra.gmra.mrb[0].mxu1 %v638_v11 }
  0x23   :  { %599 = vmatprep.mubr.bf16.mxu0 %v639_v12  ;;  %607 = vmatprep.mubr.bf16.mxu1 %v640_v13 }
  0x2a   :  { %600 = vmatmul.mubr.bf16.gmra.mrb[4].mxu0 %v641_v14  ;;  %608 = vmatmul.mubr.bf16.gmra.mrb[4].mxu1 %v642_v15 }
  0xf5   :  { %v597_v23 = vpop.f32.mrb[0].mxu0  ;;  %v605_v24 = vpop.f32.mrb[0].mxu1 }
  0xf6   :  { %v334_v25 = vmul.f32 %v597_v23, %v331_v21  ;;  %v342_v26 = vmul.f32 %v605_v24, %v331_v21  ;;  %v213_v27 = vpop.f32.mrb[1].mxu0  ;;  %v245_v28 = vpop.f32.mrb[1].mxu1 }
  0xf7   :  { %v332_v29 = vmul.f32 %v331_v21, %v213_v27  ;;  %v340_v30 = vmul.f32 %v331_v21, %v245_v28  ;;  %v598_v31 = vpop.f32.mrb[2].mxu0  ;;  %v606_v32 = vpop.f32.mrb[2].mxu1 }
  0xf8   :  { %v354_v33 = vadd.f32 %v714_v22, %v334_v25  ;;  %v362_v34 = vadd.f32 %v714_v22, %v342_v26  ;;  %v335_v35 = vmul.f32 %v598_v31, %v331_v21  ;;  %v343_v36 = vmul.f32 %v606_v32, %v331_v21  ;;  %v216_v37 = vpop.f32.mrb[3].mxu0  ;;  %v248_v38 = vpop.f32.mrb[3].mxu1 }
  0xf9   :  { %v352_v39 = vadd.f32 %v714_v22, %v332_v29  ;;  %v360_v40 = vadd.f32 %v714_v22, %v340_v30  ;;  %v333_v41 = vmul.f32 %v331_v21, %v216_v37  ;;  %v341_v42 = vmul.f32 %v331_v21, %v248_v38 }
  0xfa   :  { %v355_v43 = vadd.f32 %v714_v22, %v335_v35  ;;  %v363_v44 = vadd.f32 %v714_v22, %v343_v36  ;;  %v370_v47 = vmax.f32 %v354_v33, 0.0  ;;  %v378_v48 = vmax.f32 %v362_v34, 0.0 }
  0xfb   :  { %v353_v45 = vadd.f32 %v714_v22, %v333_v41  ;;  %v361_v46 = vadd.f32 %v714_v22, %v341_v42  ;;  %v368_v51 = vmax.f32 %v352_v39, 0.0  ;;  %v376_v52 = vmax.f32 %v360_v40, 0.0 }
  0xfc   :  { %v371_v49 = vmax.f32 %v355_v43, 0.0  ;;  %v379_v50 = vmax.f32 %v363_v44, 0.0 }
  0xfd   :  { %v369_v53 = vmax.f32 %v353_v45, 0.0  ;;  %v377_v54 = vmax.f32 %v361_v46, 0.0  ;;  %v601_v55 = vpop.f32.mrb[4].mxu0  ;;  %v609_v56 = vpop.f32.mrb[4].mxu1 }
  0xfe   :  { %v524_v57 = vpack.c.bf16 %v371_v49, %v370_v47  ;;  %v544_v58 = vpack.c.bf16 %v379_v50, %v378_v48  ;;  %v338_v59 = vmul.f32 %v601_v55, %v331_v21  ;;  %v346_v60 = vmul.f32 %v609_v56, %v331_v21  ;;  %v229_v61 = vpop.f32.mrb[5].mxu0  ;;  %v261_v62 = vpop.f32.mrb[5].mxu1 }
  0xff   :  { %v519_v63 = vpack.c.bf16 %v369_v53, %v368_v51  ;;  %v539_v0 = vpack.c.bf16 %v377_v54, %v376_v52  ;;  %v336_v1 = vmul.f32 %v331_v21, %v229_v61  ;;  %v344_v2 = vmul.f32 %v331_v21, %v261_v62  ;;  %v602_v3 = vpop.f32.mrb[6].mxu0  ;;  %v610_v4 = vpop.f32.mrb[6].mxu1 }
 0x100   :  { %556 = vst [vmem:[%s759_s3 + $0x8] sm:$0xff] %v524_v57   ;;  %560 = vst [vmem:[%s759_s3 + $0x28] sm:$0xff] %v544_v58   ;;  %v358_v5 = vadd.f32 %v714_v22, %v338_v59  ;;  %v366_v6 = vadd.f32 %v714_v22, %v346_v60  ;;  %v339_v7 = vmul.f32 %v602_v3, %v331_v21  ;;  %v232_v9 = vpop.f32.mrb[7].mxu0  ;;  %v264_v10 = vpop.f32.mrb[7].mxu1 }
 0x101   :  { %v347_v8 = vmul.f32 %v610_v4, %v331_v21  ;;  %520 = vst [vmem:[%s759_s3] sm:$0xff] %v519_v63   ;;  %559 = vst [vmem:[%s759_s3 + $0x20] sm:$0xff] %v539_v0   ;;  %v356_v11 = vadd.f32 %v714_v22, %v336_v1  ;;  %v364_v12 = vadd.f32 %v714_v22, %v344_v2 }
 0x102   :  { %v337_v13 = vmul.f32 %v331_v21, %v232_v9  ;;  %v345_v14 = vmul.f32 %v331_v21, %v264_v10  ;;  %v359_v15 = vadd.f32 %v714_v22, %v339_v7  ;;  %v374_v19 = vmax.f32 %v358_v5, 0.0 }
 0x103   :  { %v367_v16 = vadd.f32 %v714_v22, %v347_v8  ;;  %v382_v20 = vmax.f32 %v366_v6, 0.0  ;;  %v372_v25 = vmax.f32 %v356_v11, 0.0  ;;  %v380_v26 = vmax.f32 %v364_v12, 0.0 }
 0x104   :  { %v357_v17 = vadd.f32 %v714_v22, %v337_v13  ;;  %v365_v18 = vadd.f32 %v714_v22, %v345_v14  ;;  %v375_v23 = vmax.f32 %v359_v15, 0.0 }
 0x105   :  { %v383_v24 = vmax.f32 %v367_v16, 0.0 }
 0x106   :  { %v373_v27 = vmax.f32 %v357_v17, 0.0  ;;  %v381_v28 = vmax.f32 %v365_v18, 0.0  ;;  %v534_v29 = vpack.c.bf16 %v375_v23, %v374_v19 }
 0x107   :  { %v554_v30 = vpack.c.bf16 %v383_v24, %v382_v20 }
 0x108   :  { %v529_v31 = vpack.c.bf16 %v373_v27, %v372_v25  ;;  %v549_v21 = vpack.c.bf16 %v381_v28, %v380_v26  ;;  %558 = vst [vmem:[%s759_s3 + $0x18] sm:$0xff] %v534_v29  }
 0x109   :  { %562 = vst [vmem:[%s759_s3 + $0x38] sm:$0xff] %v554_v30  }
 0x10a   :  { %557 = vst [vmem:[%s759_s3 + $0x10] sm:$0xff] %v529_v31   ;;  %561 = vst [vmem:[%s759_s3 + $0x30] sm:$0xff] %v549_v21  }

// kernel: ged_basic_block_forward.3
= control target key start
LH: loop header
LB: loop body
LE: loop exit
PB: predicated region body
PF: predicated region fallthrough
CT: control target
= control target key end

     0   :  { %v337_v32 = vlaneseq  ;;  %s1112_s1 = inlined_call_operand.vmem [shape: bf16[128,128], index: 1, kind: input, shape index: {}]   ;;  %s1113_s4 = inlined_call_operand.vmem [shape: bf16[128,128], index: 4, kind: input, shape index: {}]   ;;  %s1114_s0 = inlined_call_operand.vmem [shape: bf16[128,128], index: 0, kind: input, shape index: {}]   ;;  %s1115_s3 = inlined_call_operand.vmem [shape: bf16[128,128], index: 3, kind: input, shape index: {}]   ;;  %s1116_s2 = inlined_call_operand.vmem [shape: f32[2,128], index: 2, kind: input, shape index: {}]   ;;  %s1117_s5 = inlined_call_operand.vmem [shape: f32[2,128], index: 5, kind: input, shape index: {}]   ;;  %s1118_s6 = inlined_call_operand.vmem [shape: f32[128,128], index: 6, kind: output, shape index: {}]  }
   0x1   :  { %v823_v0 = vld [vmem:[%s1112_s1] sm:$0xff]   ;;  %v825_v2 = vld [vmem:[%s1112_s1 + $0x8] sm:$0xff]   ;;  %v827_v4 = vld [vmem:[%s1112_s1 + $0x10] sm:$0xff]  }
   0x2   :  { %v824_v1 = vld [vmem:[%s1113_s4] sm:$0xff]   ;;  %759 = vmatprep.subr.bf16.mxu0 %v823_v0  ;;  %v826_v3 = vld [vmem:[%s1113_s4 + $0x8] sm:$0xff]   ;;  %v828_v5 = vld [vmem:[%s1113_s4 + $0x10] sm:$0xff]   ;;  %v338_v33 = vshrl.u32 %v337_v32, 7 }
   0x3   :  { %791 = vmatprep.subr.bf16.mxu1 %v824_v1  ;;  %760 = vmatpush3.bf16.msra.mxu0 %v823_v0  ;;  %v829_v6 = vld [vmem:[%s1112_s1 + $0x18] sm:$0xff]   ;;  %v831_v8 = vld [vmem:[%s1112_s1 + $0x20] sm:$0xff]   ;;  %v833_v10 = vld [vmem:[%s1112_s1 + $0x28] sm:$0xff]  }
   0x4   :  { %792 = vmatpush3.bf16.msra.mxu1 %v824_v1  ;;  %761 = vmatprep.subr.bf16.mxu0 %v825_v2  ;;  %v830_v7 = vld [vmem:[%s1113_s4 + $0x18] sm:$0xff]   ;;  %v832_v9 = vld [vmem:[%s1113_s4 + $0x20] sm:$0xff]   ;;  %v834_v11 = vld [vmem:[%s1113_s4 + $0x28] sm:$0xff]   ;;  %v339_v34 = vsub.s32 0, %v338_v33  ;;  %v359_v36 = vsub.s32 1, %v338_v33 }
   0x5   :  { %793 = vmatprep.subr.bf16.mxu1 %v826_v3  ;;  %v839_v12 = vld [vmem:[%s1114_s0] sm:$0xff]   ;;  %v835_v14 = vld [vmem:[%s1112_s1 + $0x30] sm:$0xff]   ;;  %v837_v16 = vld [vmem:[%s1112_s1 + $0x38] sm:$0xff]  }
   0x6   :  { %v840_v13 = vld [vmem:[%s1115_s3] sm:$0xff]   ;;  %775 = vmatprep.mubr.bf16.mxu0 %v839_v12  ;;  %v836_v15 = vld [vmem:[%s1113_s4 + $0x30] sm:$0xff]   ;;  %v838_v17 = vld [vmem:[%s1113_s4 + $0x38] sm:$0xff]  }
   0x7   :  { %762 = vmatpush3.bf16.msra.mxu0 %v825_v2  ;;  %807 = vmatprep.mubr.bf16.mxu1 %v840_v13  ;;  %v841_v18 = vld [vmem:[%s1114_s0 + $0x8] sm:$0xff]   ;;  %v843_v20 = vld [vmem:[%s1114_s0 + $0x10] sm:$0xff]   ;;  %v845_v22 = vld [vmem:[%s1114_s0 + $0x18] sm:$0xff]  }
   0x8   :  { %794 = vmatpush3.bf16.msra.mxu1 %v826_v3  ;;  %763 = vmatprep.subr.bf16.mxu0 %v827_v4  ;;  %v842_v19 = vld [vmem:[%s1115_s3 + $0x8] sm:$0xff]   ;;  %v844_v21 = vld [vmem:[%s1115_s3 + $0x10] sm:$0xff]   ;;  %v846_v23 = vld [vmem:[%s1115_s3 + $0x18] sm:$0xff]  }
   0x9   :  { %795 = vmatprep.subr.bf16.mxu1 %v828_v5  ;;  %v847_v24 = vld [vmem:[%s1114_s0 + $0x20] sm:$0xff]   ;;  %v849_v26 = vld [vmem:[%s1114_s0 + $0x28] sm:$0xff]   ;;  %v851_v28 = vld [vmem:[%s1114_s0 + $0x30] sm:$0xff]  }
   0xa   :  { %v848_v25 = vld [vmem:[%s1115_s3 + $0x20] sm:$0xff]   ;;  %v850_v27 = vld [vmem:[%s1115_s3 + $0x28] sm:$0xff]   ;;  %v852_v29 = vld [vmem:[%s1115_s3 + $0x30] sm:$0xff]  }
   0xb   :  { %764 = vmatpush3.bf16.msra.mxu0 %v827_v4  ;;  %v853_v30 = vld [vmem:[%s1114_s0 + $0x38] sm:$0xff]   ;;  %v320_v35 = vld [vmem:[%s1116_s2] sm:$0x3] }
   0xc   :  { %796 = vmatpush3.bf16.msra.mxu1 %v828_v5  ;;  %765 = vmatprep.subr.bf16.mxu0 %v829_v6  ;;  %v854_v31 = vld [vmem:[%s1115_s3 + $0x38] sm:$0xff]   ;;  %v377_v37 = vld [vmem:[%s1117_s5] sm:$0x3]  ;;  %v992_v38 = vrot.slane %v320_v35, %v339_v34  ;;  %v996_v40 = vrot.slane %v320_v35, %v359_v36 }
   0xd   :  { %797 = vmatprep.subr.bf16.mxu1 %v830_v7  ;;  %v994_v39 = vrot.slane %v377_v37, %v339_v34  ;;  %v1002_v50 = vrot.slane %v377_v37, %v359_v36 }
   0xf   :  { %766 = vmatpush3.bf16.msra.mxu0 %v829_v6 }
  0x10   :  { %798 = vmatpush3.bf16.msra.mxu1 %v830_v7  ;;  %767 = vmatprep.subr.bf16.mxu0 %v831_v8 }
  0x11   :  { %799 = vmatprep.subr.bf16.mxu1 %v832_v9 }
  0x13   :  { %768 = vmatpush3.bf16.msra.mxu0 %v831_v8 }
  0x14   :  { %800 = vmatpush3.bf16.msra.mxu1 %v832_v9  ;;  %769 = vmatprep.subr.bf16.mxu0 %v833_v10 }
  0x15   :  { %801 = vmatprep.subr.bf16.mxu1 %v834_v11 }
  0x17   :  { %770 = vmatpush3.bf16.msra.mxu0 %v833_v10 }
  0x18   :  { %802 = vmatpush3.bf16.msra.mxu1 %v834_v11  ;;  %771 = vmatprep.subr.bf16.mxu0 %v835_v14 }
  0x19   :  { %803 = vmatprep.subr.bf16.mxu1 %v836_v15 }
  0x1b   :  { %772 = vmatpush3.bf16.msra.mxu0 %v835_v14 }
  0x1c   :  { %804 = vmatpush3.bf16.msra.mxu1 %v836_v15  ;;  %773 = vmatprep.subr.bf16.mxu0 %v837_v16 }
  0x1d   :  { %805 = vmatprep.subr.bf16.mxu1 %v838_v17 }
  0x1f   :  { %774 = vmatpush3.bf16.msra.mxu0 %v837_v16 }
  0x20   :  { %806 = vmatpush3.bf16.msra.mxu1 %v838_v17 }
  0x22   :  { %776 = vmatmul.mubr.bf16.vlgmr.msra.gmra.mrb[0].mxu0 %v841_v18 }
  0x23   :  { %808 = vmatmul.mubr.bf16.vlgmr.msra.gmra.mrb[0].mxu1 %v842_v19  ;;  %779 = vmatprep.mubr.bf16.mxu0 %v843_v20 }
  0x24   :  { %811 = vmatprep.mubr.bf16.mxu1 %v844_v21 }
  0x2a   :  { %780 = vmatmul.mubr.bf16.gmra.mrb[4].mxu0 %v845_v22 }
  0x2b   :  { %812 = vmatmul.mubr.bf16.gmra.mrb[4].mxu1 %v846_v23  ;;  %783 = vmatprep.mubr.bf16.mxu0 %v847_v24 }
  0x2c   :  { %815 = vmatprep.mubr.bf16.mxu1 %v848_v25 }
  0x32   :  { %784 = vmatmul.mubr.bf16.gmra.mrb[8].mxu0 %v849_v26 }
  0x33   :  { %816 = vmatmul.mubr.bf16.gmra.mrb[8].mxu1 %v850_v27  ;;  %787 = vmatprep.mubr.bf16.mxu0 %v851_v28 }
  0x34   :  { %819 = vmatprep.mubr.bf16.mxu1 %v852_v29 }
  0x3a   :  { %788 = vmatmul.mubr.bf16.gmra.mrb[12].mxu0 %v853_v30 }
  0x3b   :  { %820 = vmatmul.mubr.bf16.gmra.mrb[12].mxu1 %v854_v31 }
  0xf5   :  { %v777_v41 = vpop.f32.mrb[0].mxu0 }
  0xf6   :  { %v343_v42 = vmul.f32 %v777_v41, %v992_v38  ;;  %v809_v43 = vpop.f32.mrb[0].mxu1  ;;  %v222_v44 = vpop.f32.mrb[1].mxu0 }
  0xf7   :  { %v609_v45 = vmul.f32 %v809_v43, %v994_v39  ;;  %v341_v46 = vmul.f32 %v992_v38, %v222_v44  ;;  %v540_v47 = vpop.f32.mrb[1].mxu1  ;;  %v778_v48 = vpop.f32.mrb[2].mxu0 }
  0xf8   :  { %v363_v49 = vadd.f32 %v996_v40, %v343_v42  ;;  %v607_v51 = vmul.f32 %v994_v39, %v540_v47  ;;  %v344_v52 = vmul.f32 %v778_v48, %v992_v38  ;;  %v810_v53 = vpop.f32.mrb[2].mxu1  ;;  %v225_v54 = vpop.f32.mrb[3].mxu0 }
  0xf9   :  { %v361_v55 = vadd.f32 %v996_v40, %v341_v46  ;;  %v342_v56 = vmul.f32 %v992_v38, %v225_v54  ;;  %v543_v57 = vpop.f32.mrb[3].mxu1  ;;  %v610_v60 = vmul.f32 %v810_v53, %v994_v39 }
  0xfa   :  { %v625_v58 = vadd.f32 %v609_v45, %v363_v49  ;;  %v364_v59 = vadd.f32 %v996_v40, %v344_v52  ;;  %v608_v63 = vmul.f32 %v994_v39, %v543_v57 }
  0xfb   :  { %v623_v61 = vadd.f32 %v607_v51, %v361_v55  ;;  %v362_v62 = vadd.f32 %v996_v40, %v342_v56 }
  0xfc   :  { %v645_v0 = vadd.f32 %v1002_v50, %v625_v58  ;;  %v626_v1 = vadd.f32 %v610_v60, %v364_v59 }
  0xfd   :  { %v643_v2 = vadd.f32 %v1002_v50, %v623_v61  ;;  %v624_v3 = vadd.f32 %v608_v63, %v362_v62  ;;  %v781_v4 = vpop.f32.mrb[4].mxu0 }
  0xfe   :  { %v661_v5 = vmax.f32 %v645_v0, 0.0  ;;  %v646_v6 = vadd.f32 %v1002_v50, %v626_v1  ;;  %v347_v7 = vmul.f32 %v781_v4, %v992_v38  ;;  %v813_v8 = vpop.f32.mrb[4].mxu1  ;;  %v238_v9 = vpop.f32.mrb[5].mxu0 }
  0xff   :  { %v659_v10 = vmax.f32 %v643_v2, 0.0  ;;  %v644_v11 = vadd.f32 %v1002_v50, %v624_v3  ;;  %v613_v12 = vmul.f32 %v813_v8, %v994_v39  ;;  %v345_v13 = vmul.f32 %v992_v38, %v238_v9  ;;  %v556_v14 = vpop.f32.mrb[5].mxu1  ;;  %v782_v15 = vpop.f32.mrb[6].mxu0 }
 0x100   :  { %677 = vst [vmem:[%s1118_s6 + $0x10] sm:$0xff] %v661_v5  ;;  %v662_v16 = vmax.f32 %v646_v6, 0.0  ;;  %v367_v17 = vadd.f32 %v996_v40, %v347_v7  ;;  %v611_v18 = vmul.f32 %v994_v39, %v556_v14  ;;  %v348_v19 = vmul.f32 %v782_v15, %v992_v38  ;;  %v814_v20 = vpop.f32.mrb[6].mxu1  ;;  %v241_v21 = vpop.f32.mrb[7].mxu0 }
 0x101   :  { %675 = vst [vmem:[%s1118_s6] sm:$0xff] %v659_v10  ;;  %v660_v22 = vmax.f32 %v644_v11, 0.0  ;;  %v365_v23 = vadd.f32 %v996_v40, %v345_v13  ;;  %v346_v24 = vmul.f32 %v992_v38, %v241_v21  ;;  %v559_v25 = vpop.f32.mrb[7].mxu1  ;;  %v614_v28 = vmul.f32 %v814_v20, %v994_v39 }
 0x102   :  { %678 = vst [vmem:[%s1118_s6 + $0x18] sm:$0xff] %v662_v16  ;;  %v629_v26 = vadd.f32 %v613_v12, %v367_v17  ;;  %v368_v27 = vadd.f32 %v996_v40, %v348_v19  ;;  %v612_v31 = vmul.f32 %v994_v39, %v559_v25 }
 0x103   :  { %676 = vst [vmem:[%s1118_s6 + $0x8] sm:$0xff] %v660_v22  ;;  %v627_v29 = vadd.f32 %v611_v18, %v365_v23  ;;  %v366_v30 = vadd.f32 %v996_v40, %v346_v24 }
 0x104   :  { %v649_v32 = vadd.f32 %v1002_v50, %v629_v26  ;;  %v630_v33 = vadd.f32 %v614_v28, %v368_v27 }
 0x105   :  { %v647_v34 = vadd.f32 %v1002_v50, %v627_v29  ;;  %v628_v35 = vadd.f32 %v612_v31, %v366_v30  ;;  %v785_v36 = vpop.f32.mrb[8].mxu0 }
 0x106   :  { %v665_v37 = vmax.f32 %v649_v32, 0.0  ;;  %v650_v41 = vadd.f32 %v1002_v50, %v630_v33  ;;  %v351_v42 = vmul.f32 %v785_v36, %v992_v38  ;;  %v817_v43 = vpop.f32.mrb[8].mxu1  ;;  %v254_v44 = vpop.f32.mrb[9].mxu0 }
 0x107   :  { %v663_v45 = vmax.f32 %v647_v34, 0.0  ;;  %v648_v46 = vadd.f32 %v1002_v50, %v628_v35  ;;  %v617_v47 = vmul.f32 %v817_v43, %v994_v39  ;;  %v349_v48 = vmul.f32 %v992_v38, %v254_v44  ;;  %v572_v49 = vpop.f32.mrb[9].mxu1  ;;  %v786_v51 = vpop.f32.mrb[10].mxu0 }
 0x108   :  { %681 = vst [vmem:[%s1118_s6 + $0x30] sm:$0xff] %v665_v37  ;;  %v666_v52 = vmax.f32 %v650_v41, 0.0  ;;  %v371_v53 = vadd.f32 %v996_v40, %v351_v42  ;;  %v615_v54 = vmul.f32 %v994_v39, %v572_v49  ;;  %v352_v55 = vmul.f32 %v786_v51, %v992_v38  ;;  %v818_v56 = vpop.f32.mrb[10].mxu1  ;;  %v257_v57 = vpop.f32.mrb[11].mxu0 }
 0x109   :  { %679 = vst [vmem:[%s1118_s6 + $0x20] sm:$0xff] %v663_v45  ;;  %v664_v58 = vmax.f32 %v648_v46, 0.0  ;;  %v369_v59 = vadd.f32 %v996_v40, %v349_v48  ;;  %v350_v60 = vmul.f32 %v992_v38, %v257_v57  ;;  %v575_v61 = vpop.f32.mrb[11].mxu1  ;;  %v618_v0 = vmul.f32 %v818_v56, %v994_v39 }
 0x10a   :  { %682 = vst [vmem:[%s1118_s6 + $0x38] sm:$0xff] %v666_v52  ;;  %v633_v62 = vadd.f32 %v617_v47, %v371_v53  ;;  %v372_v63 = vadd.f32 %v996_v40, %v352_v55  ;;  %v616_v3 = vmul.f32 %v994_v39, %v575_v61 }
 0x10b   :  { %680 = vst [vmem:[%s1118_s6 + $0x28] sm:$0xff] %v664_v58  ;;  %v631_v1 = vadd.f32 %v615_v54, %v369_v59  ;;  %v370_v2 = vadd.f32 %v996_v40, %v350_v60 }
 0x10c   :  { %v653_v4 = vadd.f32 %v1002_v50, %v633_v62  ;;  %v634_v5 = vadd.f32 %v618_v0, %v372_v63 }
 0x10d   :  { %v651_v6 = vadd.f32 %v1002_v50, %v631_v1  ;;  %v632_v7 = vadd.f32 %v616_v3, %v370_v2  ;;  %v789_v8 = vpop.f32.mrb[12].mxu0 }
 0x10e   :  { %v669_v9 = vmax.f32 %v653_v4, 0.0  ;;  %v654_v10 = vadd.f32 %v1002_v50, %v634_v5  ;;  %v355_v11 = vmul.f32 %v789_v8, %v992_v38  ;;  %v821_v12 = vpop.f32.mrb[12].mxu1  ;;  %v270_v13 = vpop.f32.mrb[13].mxu0 }
 0x10f   :  { %v667_v14 = vmax.f32 %v651_v6, 0.0  ;;  %v652_v15 = vadd.f32 %v1002_v50, %v632_v7  ;;  %v621_v16 = vmul.f32 %v821_v12, %v994_v39  ;;  %v353_v17 = vmul.f32 %v992_v38, %v270_v13  ;;  %v588_v18 = vpop.f32.mrb[13].mxu1  ;;  %v790_v19 = vpop.f32.mrb[14].mxu0 }
 0x110   :  { %685 = vst [vmem:[%s1118_s6 + $0x50] sm:$0xff] %v669_v9  ;;  %v670_v20 = vmax.f32 %v654_v10, 0.0  ;;  %v375_v21 = vadd.f32 %v996_v40, %v355_v11  ;;  %v619_v22 = vmul.f32 %v994_v39, %v588_v18  ;;  %v356_v23 = vmul.f32 %v790_v19, %v992_v38  ;;  %v822_v24 = vpop.f32.mrb[14].mxu1  ;;  %v273_v25 = vpop.f32.mrb[15].mxu0 }
 0x111   :  { %683 = vst [vmem:[%s1118_s6 + $0x40] sm:$0xff] %v667_v14  ;;  %v668_v26 = vmax.f32 %v652_v15, 0.0  ;;  %v373_v27 = vadd.f32 %v996_v40, %v353_v17  ;;  %v354_v28 = vmul.f32 %v992_v38, %v273_v25  ;;  %v591_v29 = vpop.f32.mrb[15].mxu1  ;;  %v622_v32 = vmul.f32 %v822_v24, %v994_v39 }
 0x112   :  { %686 = vst [vmem:[%s1118_s6 + $0x58] sm:$0xff] %v670_v20  ;;  %v637_v30 = vadd.f32 %v621_v16, %v375_v21  ;;  %v376_v31 = vadd.f32 %v996_v40, %v356_v23  ;;  %v620_v35 = vmul.f32 %v994_v39, %v591_v29 }
 0x113   :  { %684 = vst [vmem:[%s1118_s6 + $0x48] sm:$0xff] %v668_v26  ;;  %v635_v33 = vadd.f32 %v619_v22, %v373_v27  ;;  %v374_v34 = vadd.f32 %v996_v40, %v354_v28 }
 0x114   :  { %v657_v38 = vadd.f32 %v1002_v50, %v637_v30  ;;  %v638_v36 = vadd.f32 %v622_v32, %v376_v31 }
 0x115   :  { %v655_v37 = vadd.f32 %v1002_v50, %v635_v33  ;;  %v636_v41 = vadd.f32 %v620_v35, %v374_v34 }
 0x116   :  { %v673_v42 = vmax.f32 %v657_v38, 0.0  ;;  %v658_v43 = vadd.f32 %v1002_v50, %v638_v36 }
 0x117   :  { %v671_v44 = vmax.f32 %v655_v37, 0.0  ;;  %v656_v45 = vadd.f32 %v1002_v50, %v636_v41 }
 0x118   :  { %689 = vst [vmem:[%s1118_s6 + $0x70] sm:$0xff] %v673_v42  ;;  %v674_v46 = vmax.f32 %v658_v43, 0.0 }
 0x119   :  { %687 = vst [vmem:[%s1118_s6 + $0x60] sm:$0xff] %v671_v44  ;;  %v672_v39 = vmax.f32 %v656_v45, 0.0 }
 0x11a   :  { %690 = vst [vmem:[%s1118_s6 + $0x78] sm:$0xff] %v674_v46 }
 0x11b   :  { %688 = vst [vmem:[%s1118_s6 + $0x68] sm:$0xff] %v672_v39 }

</bundles_post_ra>
